<compile_context>
chip_gen: v5e
topology: v5e:2x2
jax: 0.10.0
libtpu: 0.0.40
codegen_flags: <defaults>
</compile_context>

<pallas_src>
import functools
import math

import jax
import jax.numpy as jnp
import numpy as np
from jax.experimental import pallas as pl
from jax.experimental.pallas import tpu as pltpu


def _round_up(v, m):
    return ((v + m - 1) // m) * m


def _pick_row_tile(rows, block_rows):
    """Row tile: multiple of 8 (or == rows); >= 2 tiles whenever feasible so
    the 1-D "parallel" grid axis can be sharded across v7x's two TensorCores."""
    if rows > block_rows:
        return _round_up(block_rows, 8)
    if rows >= 16:
        half = _round_up((rows + 1) // 2, 8)
        if half < rows:
            return half
    return rows  # single full-extent tile (block == array dim satisfies 8-rule)


# --------------------------------------------------------------------------
# Pallas kernel: fused (GRU gates + 0.5*concat-Linear) per-timestep MXU dot,
# single-layer GRU recurrence (final hidden state), invar + 0.5*h mix.
# --------------------------------------------------------------------------
def _semantic_expander_kernel(x_ref,        # [TR, K*D]   input dtype (e.g. f32)
                              w_f_ref,      # [K, D, 4D]  matmul dtype: r|z|n | 0.5*lin_t
                              w_h_ref,      # [D, 3D]     matmul dtype (r|z|n)
                              b_i_ref,      # [1, 3D]     f32
                              b_h_ref,      # [1, 3D]     f32
                              b_lin_ref,    # [1, D]      f32 (0.5-scaled)
                              out_ref,      # [TR, D]
                              *, k, d):
    mm = w_f_ref.dtype
    w_h = w_h_ref[...]
    b_i = b_i_ref[...]
    b_h = b_h_ref[...]

    rows = x_ref.shape[0]
    invar = jnp.zeros((rows, d), jnp.float32)
    h = jnp.zeros((rows, d), jnp.float32)

    # K is tiny and static -> fully unrolled.  The input-side gate dot is
    # computed just-in-time per step (it does not depend on h, so the LLO
    # scheduler still overlaps the t+1 dot with step-t elementwise work),
    # keeping peak live intermediates ~K x smaller than a hoisted gi list.
    for t in range(k):
        # Per-chunk load straight from the VMEM block + in-kernel cast
        # (no wrapper-side astype pass over HBM).
        x_t = x_ref[:, t * d:(t + 1) * d].astype(mm)
        # One fused MXU dot: [TR, D] x [D, 4D] -> gates (3D) | 0.5*Linear slice (D)
        p = jnp.dot(x_t, w_f_ref[t], preferred_element_type=jnp.float32)
        invar = invar + p[:, 3 * d:]
        g = p[:, :3 * d] + b_i
        if t == 0:
            gh = b_h                                   # h0 == 0 -> hidden dot vanishes
        else:
            gh = jnp.dot(h.astype(mm), w_h,
                         preferred_element_type=jnp.float32) + b_h
        # PyTorch gate order: r, z, n.  Sub-128-lane slices for D<128 cost a
        # few XLU relayouts; aligned (D multiple of 128) slices are free.
        r = jax.nn.sigmoid(g[:, :d] + gh[:, :d])
        z = jax.nn.sigmoid(g[:, d:2 * d] + gh[:, d:2 * d])
        n = jnp.tanh(g[:, 2 * d:] + r * gh[:, 2 * d:])
        h = (1.0 - z) * n + z * h

    # TODO(synk): lane-dense (R//g, g*D) output packing for D < 128 needs an
    # in-kernel sublane->lane reshape (Mosaic relayout); kept (TR, D) stores,
    # with an optional bf16 out_dtype to halve writeback instead.
    out_ref[...] = (invar + b_lin_ref[...] + 0.5 * h).astype(out_ref.dtype)


# --------------------------------------------------------------------------
# JAX-side module: parameters + wrapper around pallas_call
# --------------------------------------------------------------------------
class SemanticExpander:
    """JAX/Pallas port of the PyTorch SemanticExpander (reducer='concat')."""

    def __init__(self, dim, order=2, reducer='concat', key=None,
                 block_rows=1024, matmul_dtype=jnp.bfloat16,
                 out_dtype=jnp.float32):
        assert reducer == 'concat', "only 'concat' reducer implemented here"
        # TODO(synk): 'mean'/'max' reducers (trivial reductions) not wired up.
        self.dim = dim
        self.order = order
        self.reducer = reducer
        # Row tile.  v7x (64 MiB VMEM): keep <= 1024 for D >= 256, K = 3.
        # v5e/v6e (128 MiB VMEM): sweep 2048..8192 for small K*D.
        self.block_rows = block_rows
        self.matmul_dtype = matmul_dtype   # bf16 dots (v6e/v7x MXU); f32 supported
        self.out_dtype = out_dtype         # set jnp.bfloat16 to halve writeback
        self._pcache = {}

        if key is None:
            key = jax.random.PRNGKey(0)
        stdv = 1.0 / math.sqrt(dim)

        def uni(k_, shape):
            return jax.random.uniform(k_, shape, jnp.float32, -stdv, stdv)

        # GRU parameters (PyTorch layout: weight_ih/hh [3D, D], gate order
        # r,z,n; biases zero-initialized as in reset_parameters()).
        self.grus = []
        for _ in range(order):
            key, k1, k2 = jax.random.split(key, 3)
            self.grus.append(dict(
                w_ih=uni(k1, (3 * dim, dim)),
                w_hh=uni(k2, (3 * dim, dim)),
                b_ih=jnp.zeros((3 * dim,), jnp.float32),
                b_hh=jnp.zeros((3 * dim,), jnp.float32),
            ))

        # Ws[j] = Linear(dim*(j+2), dim), j = 0 .. order-2 (mirrors range(1, order)).
        self.Ws = []
        for i in range(1, order):
            key, k1 = jax.random.split(key)
            self.Ws.append(dict(
                w=uni(k1, (dim, dim * (i + 1))),   # PyTorch Linear weight [out, in]
                b=jnp.zeros((dim,), jnp.float32),
            ))

    # One-time (cached) constant folding of the kernel parameters.
    def _prepared(self, k):
        mm = self.matmul_dtype
        ck = (k, jnp.dtype(mm).name)
        if ck not in self._pcache:
            d = self.dim
            gru = self.grus[k - 2]
            lin = self.Ws[k - 2]
            w_i3 = gru['w_ih'].T                   # [D, 3D] (r|z|n)
            w_lin = 0.5 * lin['w'].T               # [K*D, D], 0.5 mix folded in
            # Per-timestep fused weight: [K, D, 4D] = (r|z|n | 0.5*lin_t)
            w_f = jnp.concatenate([jnp.tile(w_i3, (k, 1)), w_lin], axis=1)
            w_f = w_f.reshape(k, d, 4 * d).astype(mm)
            self._pcache[ck] = (
                w_f,
                gru['w_hh'].T.astype(mm),                            # [D, 3D]
                gru['b_ih'].reshape(1, 3 * d).astype(jnp.float32),
                gru['b_hh'].reshape(1, 3 * d).astype(jnp.float32),
                (0.5 * lin['b']).reshape(1, d).astype(jnp.float32),
            )
        return self._pcache[ck]

    def __call__(self, x):
        shape = list(x.shape)
        if len(shape) < 4:
            return x
        k, d = shape[-2], shape[-1]
        assert 2 <= k and k - 2 < self.order
        assert d == self.dim

        w_f, w_h, b_i, b_h, b_lin = self._prepared(k)

        # [..., K, D] -> [R, K*D]: identical row-major layout (no real data
        # movement; free under jit).  No pad, no astype, no output slice.
        x_flat = x.reshape(-1, k * d)
        R = x_flat.shape[0]

        tr = _pick_row_tile(R, self.block_rows)
        grid = (pl.cdiv(R, tr),)   # partial last tile: OOB rows dropped on writeback

        mm_b = jnp.dtype(self.matmul_dtype).itemsize
        x_b = jnp.dtype(x_flat.dtype).itemsize
        out_dtype = self.out_dtype
        out_b = jnp.dtype(out_dtype).itemsize

        cost = pl.CostEstimate(
            flops=int(R * (8 * k + 6 * (k - 1)) * d * d + R * 12 * k * d),
            transcendentals=int(R * 3 * k * d),
            bytes_accessed=int(R * k * d * x_b + R * d * out_b
                               + (4 * k + 3) * d * d * mm_b + 7 * d * 4),
        )

        # VMEM budget: x/out double buffers + resident weights + rough peak
        # live intermediates; clamp to [32 MiB, 64 MiB] (v7x physical VMEM).
        block_vmem = (2 * tr * k * d * x_b + 2 * tr * d * out_b
                      + 2 * (4 * k + 3) * d * d * mm_b + 14 * d * 4
                      + 12 * tr * d * 4)
        vmem_limit = int(min(max(2 * block_vmem, 32 << 20), 64 << 20))

        out = pl.pallas_call(
            functools.partial(_semantic_expander_kernel, k=k, d=d),
            out_shape=jax.ShapeDtypeStruct((R, d), out_dtype),
            grid=grid,
            in_specs=[
                pl.BlockSpec((tr, k * d), lambda i: (i, 0)),        # x (pipelined)
                pl.BlockSpec((k, d, 4 * d), lambda i: (0, 0, 0)),   # fused W (resident)
                pl.BlockSpec((d, 3 * d), lambda i: (0, 0)),         # W_hh
                pl.BlockSpec((1, 3 * d), lambda i: (0, 0)),         # b_ih
                pl.BlockSpec((1, 3 * d), lambda i: (0, 0)),         # b_hh
                pl.BlockSpec((1, d), lambda i: (0, 0)),             # 0.5*b_lin
            ],
            out_specs=pl.BlockSpec((tr, d), lambda i: (i, 0)),
            compiler_params=pltpu.CompilerParams(
                dimension_semantics=("parallel",),
                vmem_limit_bytes=vmem_limit),
            cost_estimate=cost,
        )(x_flat, w_f, w_h, b_i, b_h, b_lin)

        return out.reshape(shape[:-2] + [d])


# --------------------------------------------------------------------------
# Pure-JAX reference for verification (f32 throughout, unfused weights)
# --------------------------------------------------------------------------
def reference_forward(module, x):
    shape = list(x.shape)
    k, d = shape[-2], shape[-1]
    gru = module.grus[k - 2]
    lin = module.Ws[k - 2]

    x_flat = x.reshape(-1, k * d)
    invar = x_flat @ lin['w'].T + lin['b']

    seq = x.reshape(-1, k, d)
    h = jnp.zeros((seq.shape[0], d), jnp.float32)
    for t in range(k):
        x_t = seq[:, t, :]
        gi = x_t @ gru['w_ih'].T + gru['b_ih']
        gh = h @ gru['w_hh'].T + gru['b_hh']
        r = jax.nn.sigmoid(gi[:, 0 * d:1 * d] + gh[:, 0 * d:1 * d])
        z = jax.nn.sigmoid(gi[:, 1 * d:2 * d] + gh[:, 1 * d:2 * d])
        n = jnp.tanh(gi[:, 2 * d:3 * d] + r * gh[:, 2 * d:3 * d])
        h = (1.0 - z) * n + z * h

    out = 0.5 * invar + 0.5 * h
    return out.reshape(shape[:-2] + [d])


if __name__ == "__main__":
    key = jax.random.PRNGKey(0)
    dim, order, K = 32, 2, 2          # K-2 < order -> uses grus[0] and Ws[0]
    kx1, kx2, kp = jax.random.split(key, 3)

    module = SemanticExpander(dim, order=order, reducer='concat', key=kp)

    # Case 1: R = 16 rows -> two full 8-row tiles (both TCs busy on v7x).
    x1 = jax.random.normal(kx1, (2, 8, K, dim), jnp.float32)
    # Case 2: R = 21 rows -> tile 16 + partial last tile (unpadded path).
    x2 = jax.random.normal(kx2, (3, 7, K, dim), jnp.float32)

    for x in (x1, x2):
        ref = reference_forward(module, x)

        # f32 matmul path: tight tolerance.
        module.matmul_dtype = jnp.float32
        out_f32 = jax.block_until_ready(module(x))
        np.testing.assert_allclose(np.asarray(out_f32), np.asarray(ref),
                                   rtol=1e-4, atol=1e-4)

        # bf16 matmul operands (f32 accumulate / elementwise): looser tolerance.
        module.matmul_dtype = jnp.bfloat16
        out_bf16 = jax.block_until_ready(module(x))
        np.testing.assert_allclose(np.asarray(out_bf16), np.asarray(ref),
                                   rtol=3e-2, atol=3e-2)

    print("KERNEL_OK")
</pallas_src>

<mosaic_0001>
module attributes {stable_mosaic.version = 11 : i64} {
  func.func @_semantic_expander_kernel(%arg0: i32, %arg1: memref<8x64xf32, #tpu.memory_space<vmem>>, %arg2: memref<2x32x128xf32, #tpu.memory_space<vmem>>, %arg3: memref<32x96xf32, #tpu.memory_space<vmem>>, %arg4: memref<1x96xf32, #tpu.memory_space<vmem>>, %arg5: memref<1x96xf32, #tpu.memory_space<vmem>>, %arg6: memref<1x32xf32, #tpu.memory_space<vmem>>, %arg7: memref<8x32xf32, #tpu.memory_space<vmem>>) attributes {dimension_semantics = [#tpu.dimension_semantics<parallel>], iteration_bounds = array<i64: 2>, scalar_prefetch = 0 : i64, scratch_operands = 0 : i64, tpu.core_type = #tpu.core_type<tc>, window_params = [{transform_indices = @transform_0, window_bounds = array<i64: 8, 64>}, {pipeline_mode = #tpu.pipeline_mode<synchronous>, transform_indices = @transform_1, window_bounds = array<i64: 2, 32, 128>}, {pipeline_mode = #tpu.pipeline_mode<synchronous>, transform_indices = @transform_2, window_bounds = array<i64: 32, 96>}, {pipeline_mode = #tpu.pipeline_mode<synchronous>, transform_indices = @transform_3, window_bounds = array<i64: 1, 96>}, {pipeline_mode = #tpu.pipeline_mode<synchronous>, transform_indices = @transform_4, window_bounds = array<i64: 1, 96>}, {pipeline_mode = #tpu.pipeline_mode<synchronous>, transform_indices = @transform_5, window_bounds = array<i64: 1, 32>}, {transform_indices = @transform_6, window_bounds = array<i64: 8, 32>}]} {
    %c0 = arith.constant 0 : index
    %c0_0 = arith.constant 0 : index
    %0 = vector.load %arg3[%c0, %c0_0] : memref<32x96xf32, #tpu.memory_space<vmem>>, vector<32x96xf32>
    %c0_1 = arith.constant 0 : index
    %c0_2 = arith.constant 0 : index
    %1 = vector.load %arg4[%c0_1, %c0_2] : memref<1x96xf32, #tpu.memory_space<vmem>>, vector<1x96xf32>
    %c0_3 = arith.constant 0 : index
    %c0_4 = arith.constant 0 : index
    %2 = vector.load %arg5[%c0_3, %c0_4] : memref<1x96xf32, #tpu.memory_space<vmem>>, vector<1x96xf32>
    %cst = arith.constant 0.000000e+00 : f32
    %3 = vector.broadcast %cst : f32 to vector<8x32xf32>
    %cst_5 = arith.constant 0.000000e+00 : f32
    %4 = vector.broadcast %cst_5 : f32 to vector<8x32xf32>
    %c0_6 = arith.constant 0 : index
    %c0_7 = arith.constant 0 : index
    %5 = vector.load %arg1[%c0_6, %c0_7] : memref<8x64xf32, #tpu.memory_space<vmem>>, vector<8x32xf32>
    %c0_8 = arith.constant 0 : index
    %c0_9 = arith.constant 0 : index
    %c0_10 = arith.constant 0 : index
    %6 = vector.load %arg2[%c0_8, %c0_9, %c0_10] : memref<2x32x128xf32, #tpu.memory_space<vmem>>, vector<1x32x128xf32>
    %7 = vector.shape_cast %6 : vector<1x32x128xf32> to vector<32x128xf32>
    %cst_11 = arith.constant dense<0.000000e+00> : vector<8x128xf32>
    %8 = tpu.matmul %5, %7, %cst_11 {dimension_numbers = #tpu.dot_dimension_numbers<[1], [0], [0], [1], [0, 0, 1, 1], [], []>} : vector<8x32xf32>, vector<32x128xf32>, vector<8x128xf32> -> vector<8x128xf32>
    %9 = vector.extract_strided_slice %8 {offsets = [0, 96], sizes = [8, 32], strides = [1, 1]} : vector<8x128xf32> to vector<8x32xf32>
    %10 = arith.addf %3, %9 : vector<8x32xf32>
    %11 = vector.extract_strided_slice %8 {offsets = [0, 0], sizes = [8, 96], strides = [1, 1]} : vector<8x128xf32> to vector<8x96xf32>
    %12 = vector.broadcast %1 : vector<1x96xf32> to vector<8x96xf32>
    %13 = arith.addf %11, %12 : vector<8x96xf32>
    %14 = vector.extract_strided_slice %13 {offsets = [0, 0], sizes = [8, 32], strides = [1, 1]} : vector<8x96xf32> to vector<8x32xf32>
    %15 = vector.extract_strided_slice %2 {offsets = [0, 0], sizes = [1, 32], strides = [1, 1]} : vector<1x96xf32> to vector<1x32xf32>
    %16 = vector.broadcast %15 : vector<1x32xf32> to vector<8x32xf32>
    %17 = arith.addf %14, %16 : vector<8x32xf32>
    %18 = arith.negf %17 : vector<8x32xf32>
    %19 = math.exp %18 : vector<8x32xf32>
    %cst_12 = arith.constant 1.000000e+00 : f32
    %20 = vector.broadcast %cst_12 : f32 to vector<8x32xf32>
    %21 = arith.addf %20, %19 : vector<8x32xf32>
    %22 = arith.divf %20, %21 : vector<8x32xf32>
    %23 = vector.extract_strided_slice %13 {offsets = [0, 32], sizes = [8, 32], strides = [1, 1]} : vector<8x96xf32> to vector<8x32xf32>
    %24 = vector.extract_strided_slice %2 {offsets = [0, 32], sizes = [1, 32], strides = [1, 1]} : vector<1x96xf32> to vector<1x32xf32>
    %25 = vector.broadcast %24 : vector<1x32xf32> to vector<8x32xf32>
    %26 = arith.addf %23, %25 : vector<8x32xf32>
    %27 = arith.negf %26 : vector<8x32xf32>
    %28 = math.exp %27 : vector<8x32xf32>
    %cst_13 = arith.constant 1.000000e+00 : f32
    %29 = vector.broadcast %cst_13 : f32 to vector<8x32xf32>
    %30 = arith.addf %29, %28 : vector<8x32xf32>
    %31 = arith.divf %29, %30 : vector<8x32xf32>
    %32 = vector.extract_strided_slice %13 {offsets = [0, 64], sizes = [8, 32], strides = [1, 1]} : vector<8x96xf32> to vector<8x32xf32>
    %33 = vector.extract_strided_slice %2 {offsets = [0, 64], sizes = [1, 32], strides = [1, 1]} : vector<1x96xf32> to vector<1x32xf32>
    %34 = vector.broadcast %33 : vector<1x32xf32> to vector<8x32xf32>
    %35 = arith.mulf %22, %34 : vector<8x32xf32>
    %36 = arith.addf %32, %35 : vector<8x32xf32>
    %37 = math.tanh %36 : vector<8x32xf32>
    %cst_14 = arith.constant 1.000000e+00 : f32
    %38 = vector.broadcast %cst_14 : f32 to vector<8x32xf32>
    %39 = arith.subf %38, %31 : vector<8x32xf32>
    %40 = arith.mulf %39, %37 : vector<8x32xf32>
    %41 = arith.mulf %31, %4 : vector<8x32xf32>
    %42 = arith.addf %40, %41 : vector<8x32xf32>
    %c0_15 = arith.constant 0 : index
    %c32 = arith.constant 32 : index
    %43 = vector.load %arg1[%c0_15, %c32] : memref<8x64xf32, #tpu.memory_space<vmem>>, vector<8x32xf32>
    %c1 = arith.constant 1 : index
    %c0_16 = arith.constant 0 : index
    %c0_17 = arith.constant 0 : index
    %44 = vector.load %arg2[%c1, %c0_16, %c0_17] : memref<2x32x128xf32, #tpu.memory_space<vmem>>, vector<1x32x128xf32>
    %45 = vector.shape_cast %44 : vector<1x32x128xf32> to vector<32x128xf32>
    %cst_18 = arith.constant dense<0.000000e+00> : vector<8x128xf32>
    %46 = tpu.matmul %43, %45, %cst_18 {dimension_numbers = #tpu.dot_dimension_numbers<[1], [0], [0], [1], [0, 0, 1, 1], [], []>} : vector<8x32xf32>, vector<32x128xf32>, vector<8x128xf32> -> vector<8x128xf32>
    %47 = vector.extract_strided_slice %46 {offsets = [0, 96], sizes = [8, 32], strides = [1, 1]} : vector<8x128xf32> to vector<8x32xf32>
    %48 = arith.addf %10, %47 : vector<8x32xf32>
    %49 = vector.extract_strided_slice %46 {offsets = [0, 0], sizes = [8, 96], strides = [1, 1]} : vector<8x128xf32> to vector<8x96xf32>
    %50 = vector.broadcast %1 : vector<1x96xf32> to vector<8x96xf32>
    %51 = arith.addf %49, %50 : vector<8x96xf32>
    %cst_19 = arith.constant dense<0.000000e+00> : vector<8x96xf32>
    %52 = tpu.matmul %42, %0, %cst_19 {dimension_numbers = #tpu.dot_dimension_numbers<[1], [0], [0], [1], [0, 0, 1, 1], [], []>} : vector<8x32xf32>, vector<32x96xf32>, vector<8x96xf32> -> vector<8x96xf32>
    %53 = vector.broadcast %2 : vector<1x96xf32> to vector<8x96xf32>
    %54 = arith.addf %52, %53 : vector<8x96xf32>
    %55 = vector.extract_strided_slice %51 {offsets = [0, 0], sizes = [8, 32], strides = [1, 1]} : vector<8x96xf32> to vector<8x32xf32>
    %56 = vector.extract_strided_slice %54 {offsets = [0, 0], sizes = [8, 32], strides = [1, 1]} : vector<8x96xf32> to vector<8x32xf32>
    %57 = arith.addf %55, %56 : vector<8x32xf32>
    %58 = arith.negf %57 : vector<8x32xf32>
    %59 = math.exp %58 : vector<8x32xf32>
    %cst_20 = arith.constant 1.000000e+00 : f32
    %60 = vector.broadcast %cst_20 : f32 to vector<8x32xf32>
    %61 = arith.addf %60, %59 : vector<8x32xf32>
    %62 = arith.divf %60, %61 : vector<8x32xf32>
    %63 = vector.extract_strided_slice %51 {offsets = [0, 32], sizes = [8, 32], strides = [1, 1]} : vector<8x96xf32> to vector<8x32xf32>
    %64 = vector.extract_strided_slice %54 {offsets = [0, 32], sizes = [8, 32], strides = [1, 1]} : vector<8x96xf32> to vector<8x32xf32>
    %65 = arith.addf %63, %64 : vector<8x32xf32>
    %66 = arith.negf %65 : vector<8x32xf32>
    %67 = math.exp %66 : vector<8x32xf32>
    %cst_21 = arith.constant 1.000000e+00 : f32
    %68 = vector.broadcast %cst_21 : f32 to vector<8x32xf32>
    %69 = arith.addf %68, %67 : vector<8x32xf32>
    %70 = arith.divf %68, %69 : vector<8x32xf32>
    %71 = vector.extract_strided_slice %51 {offsets = [0, 64], sizes = [8, 32], strides = [1, 1]} : vector<8x96xf32> to vector<8x32xf32>
    %72 = vector.extract_strided_slice %54 {offsets = [0, 64], sizes = [8, 32], strides = [1, 1]} : vector<8x96xf32> to vector<8x32xf32>
    %73 = arith.mulf %62, %72 : vector<8x32xf32>
    %74 = arith.addf %71, %73 : vector<8x32xf32>
    %75 = math.tanh %74 : vector<8x32xf32>
    %cst_22 = arith.constant 1.000000e+00 : f32
    %76 = vector.broadcast %cst_22 : f32 to vector<8x32xf32>
    %77 = arith.subf %76, %70 : vector<8x32xf32>
    %78 = arith.mulf %77, %75 : vector<8x32xf32>
    %79 = arith.mulf %70, %42 : vector<8x32xf32>
    %80 = arith.addf %78, %79 : vector<8x32xf32>
    %c0_23 = arith.constant 0 : index
    %c0_24 = arith.constant 0 : index
    %81 = vector.load %arg6[%c0_23, %c0_24] : memref<1x32xf32, #tpu.memory_space<vmem>>, vector<1x32xf32>
    %82 = vector.broadcast %81 : vector<1x32xf32> to vector<8x32xf32>
    %83 = arith.addf %48, %82 : vector<8x32xf32>
    %cst_25 = arith.constant 5.000000e-01 : f32
    %84 = vector.broadcast %cst_25 : f32 to vector<8x32xf32>
    %85 = arith.mulf %84, %80 : vector<8x32xf32>
    %86 = arith.addf %83, %85 : vector<8x32xf32>
    %c0_26 = arith.constant 0 : index
    %c0_27 = arith.constant 0 : index
    %87 = vector.load %arg7[%c0_26, %c0_27] : memref<8x32xf32, #tpu.memory_space<vmem>>, vector<8x32xf32>
    tpu.vector_store %arg7[%c0_26, %c0_27], %86 {strides = array<i32>} : memref<8x32xf32, #tpu.memory_space<vmem>>, vector<8x32xf32>,
    return
  }
  func.func @transform_0(%arg0: i32) -> (i32, i32) {
    %c0_i32 = arith.constant 0 : i32
    %c0_i32_0 = arith.constant 0 : i32
    return %arg0, %c0_i32 : i32, i32
  }
  func.func @transform_1(%arg0: i32) -> (i32, i32, i32) {
    %c0_i32 = arith.constant 0 : i32
    %c0_i32_0 = arith.constant 0 : i32
    %c0_i32_1 = arith.constant 0 : i32
    %c0_i32_2 = arith.constant 0 : i32
    return %c0_i32, %c0_i32_0, %c0_i32_1 : i32, i32, i32
  }
  func.func @transform_2(%arg0: i32) -> (i32, i32) {
    %c0_i32 = arith.constant 0 : i32
    %c0_i32_0 = arith.constant 0 : i32
    %c0_i32_1 = arith.constant 0 : i32
    return %c0_i32, %c0_i32_0 : i32, i32
  }
  func.func @transform_3(%arg0: i32) -> (i32, i32) {
    %c0_i32 = arith.constant 0 : i32
    %c0_i32_0 = arith.constant 0 : i32
    %c0_i32_1 = arith.constant 0 : i32
    return %c0_i32, %c0_i32_0 : i32, i32
  }
  func.func @transform_4(%arg0: i32) -> (i32, i32) {
    %c0_i32 = arith.constant 0 : i32
    %c0_i32_0 = arith.constant 0 : i32
    %c0_i32_1 = arith.constant 0 : i32
    return %c0_i32, %c0_i32_0 : i32, i32
  }
  func.func @transform_5(%arg0: i32) -> (i32, i32) {
    %c0_i32 = arith.constant 0 : i32
    %c0_i32_0 = arith.constant 0 : i32
    %c0_i32_1 = arith.constant 0 : i32
    return %c0_i32, %c0_i32_0 : i32, i32
  }
  func.func @transform_6(%arg0: i32) -> (i32, i32) {
    %c0_i32 = arith.constant 0 : i32
    %c0_i32_0 = arith.constant 0 : i32
    return %arg0, %c0_i32 : i32, i32
  }
}

</mosaic_0001>

<bundles_post_ra>
// kernel: tpu_custom_call.1
= control target key start
LH: loop header
LB: loop body
LE: loop exit
PB: predicated region body
PF: predicated region fallthrough
CT: control target
= control target key end

     0   :  { %s1094_s0 = inlined_call_operand.hbm [shape: f32[16,64], index: 0, kind: input, shape index: {}]   ;;  %s1095_s1 = inlined_call_operand.hbm [shape: f32[2,32,128], index: 1, kind: input, shape index: {}]   ;;  %s1096_s2 = inlined_call_operand.hbm [shape: f32[32,96], index: 2, kind: input, shape index: {}]   ;;  %s1097_s3 = inlined_call_operand.vmem [shape: f32[1,96], index: 3, kind: input, shape index: {}]   ;;  %s1098_s4 = inlined_call_operand.vmem [shape: f32[1,96], index: 4, kind: input, shape index: {}]   ;;  %s1099_s5 = inlined_call_operand.vmem [shape: f32[1,32], index: 5, kind: input, shape index: {}]   ;;  %s1100_s6 = inlined_call_operand.hbm [shape: f32[16,32], index: 6, kind: output, shape index: {}]  }
   0x1   :  { %1101 = sst [smem:[#allocation12_spill]] %s1095_s1 }
   0x2   :  { %11 = vsyncpa [#allocation3], 0 }
   0x3   :  { %13 = vsyncpa [#allocation3 + $0x1], 0 }
   0x4   :  { %14 = vsyncpa [#allocation6], 0 }
   0x5   :  { %15 = vsyncpa [#allocation4], 0 }
   0x6   :  { %17 = vsyncpa [#allocation4 + $0x1], 0  ;;  %s913_s21 = smov 0   ;;  %s915_s22 = smov 0  }
   0x7   :  { %s917_s23 = smov 0   ;;  %s919_s24 = smov 0  }
   0x8 LB: > { %s1102_s1 = sld [smem:[#allocation12_spill]]  ;;  %s937_s28 = sadd.s32 4294967295, %s869_s24   ;;  %s869_s24 = sphi %s919_s24, %s1113_s24   ;;  %s865_s23 = sphi %s917_s23, %s1112_s23   ;;  %s861_s22 = sphi %s915_s22, %s1111_s22   ;;  %s857_s21 = sphi %s913_s21, %s1110_s21  }
   0x9   : > { %p602_p0 = scmp.ge.s32.totalorder %s869_s24, 1  ;;  %p44_p1 = scmp.eq.s32.totalorder %s937_s28, 0 }
   0xa   : > { %p185_p2 = scmp.lt.s32.totalorder %s869_s24, 3  ;;  %s871_s30 = smov [#allocation5]  }
   0xb   : > { %s198_s7 = sshll.u32 %s871_s30, 4  ;;  %s210_s10 = sshll.u32 %s1096_s2, 4  ;;  %s199_s7 = int_to_ptr.vmem [resolvable:$true] %s198_s7  ;;  %s211_s10 = int_to_ptr.hbm [resolvable:$true] %s210_s10 }
   0xc   : > { %p942_p3 = pnand %p602_p0, %p185_p2  ;;  %s872_s11 = smov [#allocation7]  }
   0xd   : > { %s212_s12 = sshll.u32 %s872_s11, 4  ;;  %s873_s13 = smov 128   ;;  %s213_s12 = int_to_ptr.vmem [resolvable:$true] %s212_s12 }
   0xe   : > { %s196_s27 = sshll.u32 %s1102_s1, 4  ;;  %p634_p4 = pneg %p942_p3  ;;  %s197_s27 = int_to_ptr.hbm [resolvable:$true] %s196_s27 }
   0xf   : > { %s874_s14 = smov 8   ;;  %s601_s15 = sadd.s32 4294967294, %s869_s24  }
  0x10   : > { %p635_p6 = pnand %p634_p4, %p44_p1  ;;  %s956_s16 = sadd.s32 1, %s869_s24  }
  0x11   : > { %s27_s17 = ssub.s32 %s869_s24, %s956_s16  ;;  %s30_s18 = sadd.s32 1, %s865_s23 }
  0x12   : > { %637 = dma.hbm_to_vmem [thread:$0]  (!%p635_p6), %s197_s27, 1024, %s199_s7, [#allocation6], %s873_s13, %s873_s13, %s874_s14  }
  0x13   : > { %640 = dma.hbm_to_vmem [thread:$0]  (!%p635_p6), %s211_s10, 512, %s213_s12, [#allocation6], %s873_s13, %s873_s13, %s874_s14  }
  0x14   : > { %p28_p7 = scmp.eq.s32.totalorder %s27_s17, 0  ;;  %p37_p8 = scmp.ne.s32.totalorder %s865_s23, %s861_s22 }
  0x15   : > { %p38_p9 = scmp.eq.s32.totalorder %s869_s24, 0  ;;  %p43_p10 = scmp.ne.s32.totalorder %s861_s22, %s857_s21 }
  0x16   : > { %s967_s19 = scalar_select %p28_p7, %s865_s23, %s30_s18  }
  0x17   : > { %p969_p11 = por %p38_p9, %p37_p8  ;;  %p975_p12 = por %p44_p1, %p43_p10 }
  0x18   : > { %p172_p13 = scmp.eq.s32.totalorder %s937_s28, 1  ;;  %p178_p0 = scmp.eq.s32.totalorder %s601_s15, 1 }
  0x19   : > { %p651_p2 = scmp.lt.s32.totalorder %s869_s24, 2  ;;  %s235_s26 = sand.u32 1, %s865_s23  }
  0x1a   : > { %p982_p4 = por %p172_p13, %p37_p8  ;;  %p986_p6 = por %p178_p0, %p43_p10 }
  0x1b   : > { %s606_s7 = sshll.u32 %s235_s26, 3  ;;  %s607_s8 = sshll.u32 %s869_s24, 3 }
  0x1c   : > { %s243_s11 = scalar_lea.hbm %s1094_s0, %s607_s8  ;;  %s239_s12 = scalar_lea.vmem [#allocation2], %s606_s7 }
  0x1d   : > { %s247_s13 = sshll.u32 %s239_s12, 4  ;;  %s245_s14 = sshll.u32 %s243_s11, 4  ;;  %s248_s13 = int_to_ptr.vmem [resolvable:$true] %s247_s13  ;;  %s246_s14 = int_to_ptr.hbm [resolvable:$true] %s245_s14 }
  0x1e   : > { %p996_p7 = pnand %p651_p2, %p969_p11  ;;  %s236_s17 = scalar_lea.sflag [#allocation3], %s235_s26 }
  0x1f   : > { %s769_s18 = sshra.s32 %s246_s14, 4  ;;  %s776_s9 = scalar_lea.hbm %s1094_s0, 16  ;;  %s770_s18 = int_to_ptr.hbm [resolvable:$true] %s769_s18 }
  0x20   : > { %s771_s1 = scalar_lea.hbm %s770_s18, 8  ;;  %p773_p9 = pneg %p996_p7 }
  0x21   : > { %p772_p8 = scmp.ne.s32.totalorder %s770_s18, %s771_s1  ;;  %p777_p11 = scmp.lt.s32.totalorder %s770_s18, %s1094_s0 }
  0x22   : > { %p778_p0 = scmp.lt.s32.totalorder %s776_s9, %s771_s1 }
  0x23   : > { %p774_p10 = pnand %p773_p9, %p772_p8 }
  0x24   : > { %p779_p2 = por %p778_p0, %p777_p11 }
  0x25   : > { %p775_p13 = pneg %p774_p10 }
  0x27   : > { %p780_p5 = pnand %p779_p2, %p775_p13 }
  0x29   : > { %783 = shalt.err (!%p780_p5)
}
  0x2a   : > { %644 = dma.hbm_to_vmem [thread:$0]  (!%p996_p7), %s246_s14, 128, %s248_s13, %s236_s17  }
  0x2b   : > { %256 = sbr.rel (%p942_p3) target bundleno = 1284 (0x504), region = 44  ;;  %s1013_s26 = sand.u32 (!%p942_p3), 1, %s861_s22  }
  0x2c   : > { %s609_s11 = sshll.u32 (!%p942_p3), %s1013_s26, 3  ;;  %s259_s12 = scalar_lea.sflag (!%p942_p3), [#allocation3], %s1013_s26 }
  0x2d   : > { %s262_s1 = scalar_lea.vmem (!%p942_p3), [#allocation2], %s609_s11 }
  0x30   : > { %844 = dma.done.wait (%p975_p12), %s259_s12, 128  }
  0x31   : > { %846 = vsyncadd (%p975_p12), %s259_s12, 4294967168 }
  0x32   : > { %848 = dma.done.wait (%p44_p1), [#allocation6], 1536  }
  0x33   : > { %850 = vsyncadd (%p44_p1), [#allocation6], 4294965760  ;;  %v312_v0 = vld [vmem:[#allocation5 + $0x18] sm:$0xff]  ;;  %v311_v2 = vld [vmem:[#allocation5 + $0x10] sm:$0xff]  ;;  %s875_s29 = smov 96   ;;  %s876_s25 = smov 64  }
  0x34   : > { %v308_v1 = vld [vmem:[%s262_s1] sm:$0xff]  ;;  %329 = vmatpush.msra.mxu0 %v312_v0  ;;  %v310_v3 = vld [vmem:[#allocation5 + $0x8] sm:$0xff]  ;;  %v309_v7 = vld [vmem:[#allocation5] sm:$0xff]  ;;  %vm313_vm0 = vcmask 261120   ;;  %s877_s8 = smov 32   ;;  %s619_s9 = sshll.u32 %s937_s28, 3 }
  0x35   : > { %388 = vrot.lane.b32.xlu2 %v308_v1, %s875_s29  ;;  %v1031_v4 = vld [vmem:[%s1098_s4] ss:$0 sm:$0xff]  ;;  %v387_v5 = vld [vmem:[#allocation5 + $0x38] sm:$0xff]  ;;  %v385_v8 = vld [vmem:[#allocation5 + $0x28] sm:$0xff]  ;;  %s507_s12 = scalar_lea.hbm %s1100_s6, %s619_s9  ;;  %s301_s1 = scalar_lea.vmem [#allocation8], %s609_s11 }
  0x36   : > { %v386_v6 = vld [vmem:[#allocation5 + $0x30] sm:$0xff]  ;;  %330 = vmatpush.msra.mxu0 %v311_v2  ;;  %404 = vmatpush.msra.mxu1 %v387_v5  ;;  %v384_v9 = vld [vmem:[#allocation5 + $0x20] sm:$0xff]  ;;  %v305_v33 = vld [vmem:[#allocation7 + $0x18] sm:$0xff]  ;;  %s511_s13 = sshll.u32 %s507_s12, 4  ;;  %s497_s14 = scalar_lea.sflag [#allocation4], %s1013_s26  ;;  %s512_s13 = int_to_ptr.hbm [resolvable:$true] %s511_s13 }
  0x37   : > { %365 = vrot.lane.b32.xlu0 %v1031_v4, %s876_s25  ;;  %v695_v11 = vld [vmem:[%s1097_s3] ss:$0 sm:$0xff]  ;;  %431 = vmatpush.msra.mxu2 %v305_v33  ;;  %v303_v35 = vld [vmem:[#allocation7 + $0x8] sm:$0xff]  ;;  %v302_v41 = vld [vmem:[#allocation7] sm:$0xff]  ;;  %s819_s18 = scalar_lea.hbm %s1100_s6, 16 }
  0x38   : > { %331 = vmatpush.msra.mxu0 %v310_v3  ;;  %405 = vmatpush.msra.mxu1 %v386_v6  ;;  %v304_v34 = vld [vmem:[#allocation7 + $0x10] sm:$0xff] }
  0x39   : > { %432 = vmatpush.msra.mxu2 %v304_v34  ;;  %v696_v45 = vld [vmem:[%s1099_s5] ss:$0 sm:$0xff] }
  0x3a   : > { %332 = vmatpush.msra.mxu0 %v309_v7  ;;  %406 = vmatpush.msra.mxu1 %v385_v8 }
  0x3b   : > { %613 = vmatmul.msk.f32.vlgmr.msra.gmra.mxu0 %vm313_vm0, %v308_v1  ;;  %433 = vmatpush.msra.mxu2 %v303_v35 }
  0x3c   : > { %407 = vmatpush.msra.mxu1 %v384_v9 }
  0x3d   : > { %434 = vmatpush.msra.mxu2 %v302_v41 }
  0x8f   : > { %v389_v10 = vpop.permute.xlu2 %388 }
  0x90   : > { %615 = vmatmul.msk.f32.vlgmr.msra.gmra.mxu1 %vm313_vm0, %v389_v10 }
  0xa9   : > { %v366_v25 = vpop.permute.xlu0 %365 }
  0xb8   : > { %v1040_v12 = vpop.f32.mrf.mxu0 }
  0xb9   : > { %v341_v13 = vadd.f32 %v695_v11, %v1040_v12 }
  0xbb   : > { %v345_v14 = vadd.f32 %v1031_v4, %v341_v13 }
  0xbd   : > { %v614_v15 = vmul.f32 -1.442695, %v345_v14 }
  0xbf   : > { %697 = vpow2.f32 %v614_v15 }
  0xc5   : > { %v698_v16 = vpop.eup %697 }
  0xc6   : > { %v349_v17 = vadd.f32 1.0, %v698_v16 }
  0xc8   : > { %699 = vrcp.f32 %v349_v17  ;;  %v361_v21 = vand.u32 2147483648, %v349_v17  ;;  %v359_v23 = vand.u32 2147483647, %v349_v17  ;;  %vm355_vm2 = vweird.f32 %v349_v17 }
  0xca   : > { %v362_v26 = vor.u32 1.1754944e-38, %v361_v21  ;;  %vm360_vm4 = vcmp.eq.f32.partialorder %v359_v23, 8.507059e+37 }
  0xce   : > { %v700_v18 = vpop.eup %699 }
  0xcf   : > { %v351_v19 = vmul.f32 %v700_v18, %v349_v17  ;;  %vm356_vm1 = vweird.f32 %v700_v18 }
  0xd0   : > { %vm357_vm3 = vmor %vm355_vm2, %vm356_vm1 }
  0xd1   : > { %v352_v20 = vsub.f32 1.0, %v351_v19 }
  0xd3   : > { %v353_v22 = vmul.f32 %v700_v18, %v352_v20 }
  0xd5   : > { %v354_v24 = vadd.f32 %v700_v18, %v353_v22 }
  0xd7   : > { %v358_v27 = vsel %vm357_vm3, %v700_v18, %v354_v24 }
  0xd8   : > { %v363_v28 = vsel %vm360_vm4, %v362_v26, %v358_v27 }
  0xd9   : > { %v368_v29 = vmul.f32 %v366_v25, %v363_v28  ;;  %v375_v36 = vsub.f32 1.0, %v363_v28  ;;  %v381_v38 = vmul.f32 0.0, %v363_v28 }
  0xdb   : > { %370 = vrot.lane.b32.xlu0 %v368_v29, %s876_s25 }
 0x10d   : > { %v409_v46 = vpop.f32.mrf.mxu1 }
 0x10e   : > { %v413_v47 = vadd.f32 %v695_v11, %v409_v46  ;;  %v412_v10 = vadd.f32 %v409_v46, %v1040_v12 }
 0x14d   : > { %v371_v30 = vpop.permute.xlu0 %370 }
 0x14e   : > { %v373_v31 = vadd.f32 %v371_v30, %v341_v13 }
 0x150   : > { %701 = vtanh.f32 %v373_v31 }
 0x156   : > { %v702_v32 = vpop.eup %701 }
 0x157   : > { %377 = vrot.lane.b32.xlu1 %v702_v32, %s875_s29 }
 0x1c9   : > { %v378_v37 = vpop.permute.xlu1 %377 }
 0x1ca   : > { %v380_v39 = vmul.f32 %v378_v37, %v375_v36 }
 0x1cc   : > { %v382_v40 = vadd.f32 %v381_v38, %v380_v39 }
 0x1ce   : > { %415 = vrot.lane.b32.xlu1 %v382_v40, %s875_s29 }
 0x240   : > { %v416_v42 = vpop.permute.xlu1 %415 }
 0x241   : > { %616 = vmatmul.msk.f32.vlgmr.msra.gmra.mxu2 %vm313_vm0, %v416_v42 }
 0x2c4   : > { %v436_v43 = vpop.f32.mrf.mxu2 }
 0x2c5   : > { %v437_v44 = vadd.f32 %v1031_v4, %v436_v43 }
 0x2c7   : > { %460 = vrot.lane.b32.xlu2 %v437_v44, %s876_s25  ;;  %v439_v48 = vadd.f32 %v437_v44, %v413_v47 }
 0x2c9   : > { %v617_v49 = vmul.f32 -1.442695, %v439_v48 }
 0x2cb   : > { %703 = vpow2.f32 %v617_v49 }
 0x2cf   : > { %481 = vrot.lane.b32.xlu2 %v696_v45, %s875_s29 }
 0x2d1   : > { %v704_v50 = vpop.eup %703 }
 0x2d2   : > { %v443_v51 = vadd.f32 1.0, %v704_v50 }
 0x2d4   : > { %705 = vrcp.f32 %v443_v51  ;;  %v455_v57 = vand.u32 2147483648, %v443_v51  ;;  %vm449_vm6 = vweird.f32 %v443_v51  ;;  %v453_v58 = vand.u32 2147483647, %v443_v51 }
 0x2d6   : > { %v456_v60 = vor.u32 1.1754944e-38, %v455_v57  ;;  %vm454_vm8 = vcmp.eq.f32.partialorder %v453_v58, 8.507059e+37 }
 0x2da   : > { %v706_v52 = vpop.eup %705 }
 0x2db   : > { %v445_v53 = vmul.f32 %v706_v52, %v443_v51  ;;  %vm450_vm5 = vweird.f32 %v706_v52 }
 0x2dc   : > { %vm451_vm7 = vmor %vm449_vm6, %vm450_vm5 }
 0x2dd   : > { %v446_v54 = vsub.f32 1.0, %v445_v53 }
 0x2df   : > { %v447_v55 = vmul.f32 %v706_v52, %v446_v54 }
 0x2e1   : > { %v448_v56 = vadd.f32 %v706_v52, %v447_v55 }
 0x2e3   : > { %v452_v59 = vsel %vm451_vm7, %v706_v52, %v448_v56 }
 0x2e4   : > { %v457_v62 = vsel %vm454_vm8, %v456_v60, %v452_v59 }
 0x2e5   : > { %v470_v3 = vsub.f32 1.0, %v457_v62  ;;  %v476_v5 = vmul.f32 %v457_v62, %v382_v40 }
 0x321   : > { %v461_v61 = vpop.permute.xlu2 %460 }
 0x322   : > { %v463_v63 = vmul.f32 %v461_v61, %v457_v62 }
 0x324   : > { %465 = vrot.lane.b32.xlu0 %v463_v63, %s876_s25 }
 0x329   : > { %v482_v9 = vpop.permute.xlu2 %481 }
 0x32a   : > { %v484_v11 = vadd.f32 %v482_v9, %v412_v10 }
 0x396   : > { %v466_v0 = vpop.permute.xlu0 %465 }
 0x397   : > { %v468_v1 = vadd.f32 %v466_v0, %v413_v47 }
 0x399   : > { %707 = vtanh.f32 %v468_v1 }
 0x39f   : > { %v708_v2 = vpop.eup %707 }
 0x3a0   : > { %472 = vrot.lane.b32.xlu1 %v708_v2, %s875_s29  ;;  %s509_s29 = sshll.u32 %s301_s1, 4  ;;  %s510_s29 = int_to_ptr.vmem [resolvable:$true] %s509_s29 }
 0x412   : > { %v473_v4 = vpop.permute.xlu1 %472 }
 0x413   : > { %v475_v6 = vmul.f32 %v473_v4, %v470_v3 }
 0x415   : > { %v477_v7 = vadd.f32 %v476_v5, %v475_v6 }
 0x417   : > { %v485_v8 = vmul.f32 0.5, %v477_v7 }
 0x419   : > { %487 = vrot.lane.b32.xlu0 %v485_v8, %s876_s25  ;;  %s813_s25 = sshra.s32 %s512_s13, 4  ;;  %s814_s25 = int_to_ptr.hbm [resolvable:$true] %s813_s25 }
 0x41a   : > { %s815_s15 = scalar_lea.hbm %s814_s25, 8  ;;  %p820_p12 = scmp.lt.s32.totalorder %s814_s25, %s1100_s6 }
 0x41b   : > { %p816_p1 = scmp.ne.s32.totalorder %s814_s25, %s815_s15  ;;  %p821_p7 = scmp.lt.s32.totalorder %s819_s18, %s815_s15 }
 0x41d   : > { %p817_p3 = pnand %p816_p1, %p982_p4  ;;  %p822_p8 = por %p821_p7, %p820_p12 }
 0x41f   : > { %p818_p5 = pneg %p817_p3 }
 0x421   : > { %p823_p9 = pnand %p822_p8, %p818_p5 }
 0x48b   : > { %v488_v13 = vpop.permute.xlu0 %487 }
 0x48c   : > { %v490_v14 = vadd.f32 %v488_v13, %v484_v11 }
 0x48e   : > { %492 = vrot.lane.b32.xlu1 %v490_v14, %s877_s8 }
 0x500   : > { %v493_v15 = vpop.permute.xlu1 %492 }
 0x501   : > { %495 = vst.msk [vmem:[%s301_s1] sm:$0xff] %vm313_vm0, %v493_v15 }
 0x502   : > { %826 = shalt.err (!%p823_p9)
}
 0x503   : > { %632 = dma.vmem_to_hbm [thread:$0]  (%p982_p4), %s510_s29, 128, %s512_s13, %s497_s14  }
 0x504 PF: > { %s523_s26 = sand.u32 1, %s857_s21   ;;  %p1109_p10 = scmp.ge.s32.totalorder %s869_s24, 2 }
 0x505   : > { %s524_s8 = scalar_lea.sflag [#allocation4], %s523_s26 }
 0x506   : > { %p646_p13 = pnand %p1109_p10, %p986_p6 }
 0x508   : > { %p647_p11 = pneg %p646_p13 }
 0x50a   : > { %852 = dma.done.wait (%p647_p11), %s524_s8, 128  }
 0x50b   : > { %854 = vsyncadd (%p647_p11), %s524_s8, 4294967168  ;;  %p20_p0 = scmp.ge.s32.totalorder %s956_s16, 4   ;;  %s1110_s21 = smov %s861_s22 }
 0x50c   : > { %s1111_s22 = smov %s865_s23  ;;  %s1112_s23 = smov %s967_s19 }
 0x50d   : > { %s1113_s24 = smov %s956_s16  ;;  %22 = sbr.rel (!%p20_p0) target bundleno = 8 (0x8), region = 98 }
 0x512   :  { %530 = vsyncpa [#allocation3], 1 }
 0x513   :  { %532 = vsyncpa [#allocation3 + $0x1], 1 }
 0x514   :  { %533 = vsyncpa [#allocation6], 1 }
 0x515   :  { %534 = vsyncpa [#allocation4], 1 }
 0x516   :  { %536 = vsyncpa [#allocation4 + $0x1], 1 }

</bundles_post_ra>
